<compile_context>
chip_gen: v5e
topology: v5e:2x2
jax: 0.10.0
libtpu: 0.0.40
codegen_flags: <defaults>
</compile_context>

<pallas_src>
import functools

import jax
import jax.numpy as jnp
from jax.experimental import pallas as pl
from jax.experimental.pallas import tpu as pltpu


def _policy_kernel(xt_ref, w1_ref, b1_ref, w2_ref, b2_ref, w3_ref, b3_ref,
                   o_ref, *, approx_recip):
    """Batch-on-lanes MLP + softmax.

    xt_ref : (state,  TB)   input block (batch on lanes)
    w*_ref : torch (out, in) weight layout, VMEM-resident across grid steps
    b*_ref : (out, 1) f32 bias columns (broadcast over lanes)
    o_ref  : (action, TB)   softmax probabilities per batch column
    """
    xt = xt_ref[...]                                   # (state, tb)

    # fc1 + ReLU : (hidden, state) @ (state, tb) -> (hidden, tb)
    w1 = w1_ref[...]
    h1 = jnp.dot(w1, xt.astype(w1.dtype),
                 preferred_element_type=jnp.float32) + b1_ref[...]
    h1 = jnp.maximum(h1, 0.0)

    # fc2 + ReLU : (2*hidden, hidden) @ (hidden, tb) -> (2*hidden, tb)
    w2 = w2_ref[...]
    h2 = jnp.dot(w2, h1.astype(w2.dtype),
                 preferred_element_type=jnp.float32) + b2_ref[...]
    h2 = jnp.maximum(h2, 0.0)

    # fc3 (logits) : (action, 2*hidden) @ (2*hidden, tb) -> (action, tb)
    w3 = w3_ref[...]
    logits = jnp.dot(w3, h2.astype(w3.dtype),
                     preferred_element_type=jnp.float32) + b3_ref[...]

    # Numerically-stable softmax over the action axis (sublane axis 0).
    # Per-lane reduction over only `action_sz` sublanes; denominator divide
    # goes to the EUP via pl.reciprocal.
    m = jnp.max(logits, axis=0, keepdims=True)
    e = jnp.exp(logits - m)
    s = jnp.sum(e, axis=0, keepdims=True)
    o_ref[...] = e * pl.reciprocal(s, approx=approx_recip)


def pack_params(params, compute_dtype=jnp.bfloat16):
    """One-time layout/dtype glue (run at init, NOT per forward call).

    Weights keep the torch (out, in) layout (batch-on-lanes kernel needs no
    transpose); biases become (out, 1) f32 columns that broadcast over lanes.
    """
    f32 = jnp.float32
    return {
        "w1": jnp.asarray(params["w1"], compute_dtype),          # (hidden, state)
        "b1": jnp.asarray(params["b1"], f32).reshape(-1, 1),     # (hidden, 1)
        "w2": jnp.asarray(params["w2"], compute_dtype),          # (2*hidden, hidden)
        "b2": jnp.asarray(params["b2"], f32).reshape(-1, 1),     # (2*hidden, 1)
        "w3": jnp.asarray(params["w3"], compute_dtype),          # (action, 2*hidden)
        "b3": jnp.asarray(params["b3"], f32).reshape(-1, 1),     # (action, 1)
    }


def _round_up(n, m):
    return ((n + m - 1) // m) * m


def _pick_tb(batch, tb_max):
    """Batch (lane-axis) tile size.

    * batch <= 128: one full-extent block (no 128-divisibility constraint).
    * otherwise: multiple of 128, capped at tb_max, and at most ~batch/2 so
      the grid has >= 2 steps for v7x's two TensorCores to split.
    """
    if batch <= 128:
        return batch
    tb_cap = max(128, (tb_max // 128) * 128)
    half = _round_up(-(-batch // 2), 128)
    return min(tb_cap, half)


@functools.partial(jax.jit, static_argnames=("tb_max", "approx_recip"))
def policy_forward(x, packed, *, tb_max=8192, approx_recip=True):
    """x: (B, state_sz) float32.  packed: output of pack_params().

    Returns softmax probabilities of shape (B, action_sz), matching the
    PyTorch module's forward().
    """
    B, state_sz = x.shape
    action_sz = packed["w3"].shape[0]

    # Cheap per-call layout glue: (B, 8) -> (8, B) puts the batch on lanes.
    xt = x.T

    tb = _pick_tb(B, tb_max)
    grid = (pl.cdiv(B, tb),)

    stream = lambda i: (0, i)     # walk along the batch/lane axis
    resident = lambda i: (0, 0)   # same block every step -> stays in VMEM

    in_specs = [
        pl.BlockSpec((state_sz, tb), stream),
        pl.BlockSpec(packed["w1"].shape, resident),
        pl.BlockSpec(packed["b1"].shape, resident),
        pl.BlockSpec(packed["w2"].shape, resident),
        pl.BlockSpec(packed["b2"].shape, resident),
        pl.BlockSpec(packed["w3"].shape, resident),
        pl.BlockSpec(packed["b3"].shape, resident),
    ]
    out_specs = pl.BlockSpec((action_sz, tb), stream)

    out_t = pl.pallas_call(
        functools.partial(_policy_kernel, approx_recip=approx_recip),
        out_shape=jax.ShapeDtypeStruct((action_sz, B), jnp.float32),
        grid=grid,
        in_specs=in_specs,
        out_specs=out_specs,
        compiler_params=pltpu.CompilerParams(
            dimension_semantics=("parallel",),       # megacore sharding on v7x
            vmem_limit_bytes=32 * 1024 * 1024,       # headroom for big tiles
        ),
    )(xt, packed["w1"], packed["b1"], packed["w2"], packed["b2"],
      packed["w3"], packed["b3"])

    # Back to the torch (B, action) layout; (action, B) is tiny so this is cheap.
    return out_t.T


def init_params(key, state_sz, hidden_sz, action_sz):
    """Deterministic synthetic init with the same shapes as Policy._goodnet."""
    ks = jax.random.split(key, 6)
    scale = 0.1
    return {
        # nn.Linear(state_sz, hidden_sz): weight (hidden, state), bias (hidden,)
        "w1": scale * jax.random.normal(ks[0], (hidden_sz, state_sz), jnp.float32),
        "b1": scale * jax.random.normal(ks[1], (hidden_sz,), jnp.float32),
        # nn.Linear(hidden_sz, 2*hidden_sz)
        "w2": scale * jax.random.normal(ks[2], (2 * hidden_sz, hidden_sz), jnp.float32),
        "b2": scale * jax.random.normal(ks[3], (2 * hidden_sz,), jnp.float32),
        # nn.Linear(2*hidden_sz, action_sz)
        "w3": scale * jax.random.normal(ks[4], (action_sz, 2 * hidden_sz), jnp.float32),
        "b3": scale * jax.random.normal(ks[5], (action_sz,), jnp.float32),
    }


def policy_forward_ref(x, params):
    """Pure-JAX reference (mirrors the PyTorch goodnet, torch param layout)."""
    h1 = jnp.maximum(x @ params["w1"].T + params["b1"], 0.0)
    h2 = jnp.maximum(h1 @ params["w2"].T + params["b2"], 0.0)
    logits = h2 @ params["w3"].T + params["b3"]
    return jax.nn.softmax(logits, axis=1)


if __name__ == "__main__":
    # PixelCopter-like sizes: state=8 features, hidden=32 (->64), 2 actions.
    state_sz, hidden_sz, action_sz = 8, 32, 2

    key = jax.random.PRNGKey(0)
    k_x1, k_x2, k_p = jax.random.split(key, 3)
    params = init_params(k_p, state_sz, hidden_sz, action_sz)

    # ---- Tight-tolerance path: f32 weights, exact reciprocal. ----------------
    packed_f32 = pack_params(params, compute_dtype=jnp.float32)

    # Case 1: tiny act()-style batch -> one grid step, full-extent lane block.
    x_small = jax.random.normal(k_x1, (4, state_sz), jnp.float32)
    out_small = jax.block_until_ready(
        policy_forward(x_small, packed_f32, approx_recip=False))
    ref_small = policy_forward_ref(x_small, params)
    assert out_small.shape == (4, action_sz)
    assert jnp.allclose(out_small, ref_small, atol=1e-5, rtol=1e-5)
    assert jnp.allclose(jnp.sum(out_small, axis=1), jnp.ones((4,)), atol=1e-5)

    # Case 2: rollout-style batch, tiled into 4 lane-dense grid steps with
    # VMEM-resident weights (exercises the pipelined / multi-step path).
    x_big = jax.random.normal(k_x2, (1024, state_sz), jnp.float32)
    out_big = jax.block_until_ready(
        policy_forward(x_big, packed_f32, tb_max=256, approx_recip=False))
    ref_big = policy_forward_ref(x_big, params)
    assert out_big.shape == (1024, action_sz)
    assert jnp.allclose(out_big, ref_big, atol=1e-5, rtol=1e-5)
    assert jnp.allclose(jnp.sum(out_big, axis=1), jnp.ones((1024,)), atol=1e-5)

    # ---- Default fast path: bf16 weights, approx reciprocal, default tiling.
    # (>=2 grid steps here: B=1024 -> tb=512, so v7x gets both TensorCores.)
    packed_bf16 = pack_params(params)  # compute_dtype=bfloat16
    out_fast = jax.block_until_ready(policy_forward(x_big, packed_bf16))
    assert out_fast.shape == (1024, action_sz)
    assert jnp.allclose(out_fast, ref_big, atol=2e-2, rtol=2e-2)
    assert jnp.allclose(jnp.sum(out_fast, axis=1), jnp.ones((1024,)), atol=1e-2)

    print("KERNEL_OK")
</pallas_src>

<mosaic_0001>
module attributes {stable_mosaic.version = 11 : i64} {
  func.func @_policy_kernel(%arg0: i32, %arg1: memref<8x4xf32, #tpu.memory_space<vmem>>, %arg2: memref<32x8xf32, #tpu.memory_space<vmem>>, %arg3: memref<32x1xf32, #tpu.memory_space<vmem>>, %arg4: memref<64x32xf32, #tpu.memory_space<vmem>>, %arg5: memref<64x1xf32, #tpu.memory_space<vmem>>, %arg6: memref<2x64xf32, #tpu.memory_space<vmem>>, %arg7: memref<2x1xf32, #tpu.memory_space<vmem>>, %arg8: memref<2x4xf32, #tpu.memory_space<vmem>>) attributes {dimension_semantics = [#tpu.dimension_semantics<parallel>], iteration_bounds = array<i64: 1>, scalar_prefetch = 0 : i64, scratch_operands = 0 : i64, tpu.core_type = #tpu.core_type<tc>, window_params = [{transform_indices = @transform_0, window_bounds = array<i64: 8, 4>}, {pipeline_mode = #tpu.pipeline_mode<synchronous>, transform_indices = @transform_1, window_bounds = array<i64: 32, 8>}, {pipeline_mode = #tpu.pipeline_mode<synchronous>, transform_indices = @transform_2, window_bounds = array<i64: 32, 1>}, {pipeline_mode = #tpu.pipeline_mode<synchronous>, transform_indices = @transform_3, window_bounds = array<i64: 64, 32>}, {pipeline_mode = #tpu.pipeline_mode<synchronous>, transform_indices = @transform_4, window_bounds = array<i64: 64, 1>}, {pipeline_mode = #tpu.pipeline_mode<synchronous>, transform_indices = @transform_5, window_bounds = array<i64: 2, 64>}, {pipeline_mode = #tpu.pipeline_mode<synchronous>, transform_indices = @transform_6, window_bounds = array<i64: 2, 1>}, {transform_indices = @transform_7, window_bounds = array<i64: 2, 4>}]} {
    %c0 = arith.constant 0 : index
    %c0_0 = arith.constant 0 : index
    %0 = vector.load %arg1[%c0, %c0_0] : memref<8x4xf32, #tpu.memory_space<vmem>>, vector<8x4xf32>
    %c0_1 = arith.constant 0 : index
    %c0_2 = arith.constant 0 : index
    %1 = vector.load %arg2[%c0_1, %c0_2] : memref<32x8xf32, #tpu.memory_space<vmem>>, vector<32x8xf32>
    %cst = arith.constant dense<0.000000e+00> : vector<32x4xf32>
    %2 = tpu.matmul %1, %0, %cst {dimension_numbers = #tpu.dot_dimension_numbers<[1], [0], [0], [1], [0, 0, 1, 1], [], []>} : vector<32x8xf32>, vector<8x4xf32>, vector<32x4xf32> -> vector<32x4xf32>
    %c0_3 = arith.constant 0 : index
    %c0_4 = arith.constant 0 : index
    %3 = vector.load %arg3[%c0_3, %c0_4] : memref<32x1xf32, #tpu.memory_space<vmem>>, vector<32x1xf32>
    %4 = vector.broadcast %3 : vector<32x1xf32> to vector<32x4xf32>
    %5 = arith.addf %2, %4 : vector<32x4xf32>
    %cst_5 = arith.constant 0.000000e+00 : f32
    %6 = vector.broadcast %cst_5 : f32 to vector<32x4xf32>
    %7 = arith.maximumf %5, %6 : vector<32x4xf32>
    %c0_6 = arith.constant 0 : index
    %c0_7 = arith.constant 0 : index
    %8 = vector.load %arg4[%c0_6, %c0_7] : memref<64x32xf32, #tpu.memory_space<vmem>>, vector<64x32xf32>
    %cst_8 = arith.constant dense<0.000000e+00> : vector<64x4xf32>
    %9 = tpu.matmul %8, %7, %cst_8 {dimension_numbers = #tpu.dot_dimension_numbers<[1], [0], [0], [1], [0, 0, 1, 1], [], []>} : vector<64x32xf32>, vector<32x4xf32>, vector<64x4xf32> -> vector<64x4xf32>
    %c0_9 = arith.constant 0 : index
    %c0_10 = arith.constant 0 : index
    %10 = vector.load %arg5[%c0_9, %c0_10] : memref<64x1xf32, #tpu.memory_space<vmem>>, vector<64x1xf32>
    %11 = vector.broadcast %10 : vector<64x1xf32> to vector<64x4xf32>
    %12 = arith.addf %9, %11 : vector<64x4xf32>
    %cst_11 = arith.constant 0.000000e+00 : f32
    %13 = vector.broadcast %cst_11 : f32 to vector<64x4xf32>
    %14 = arith.maximumf %12, %13 : vector<64x4xf32>
    %c0_12 = arith.constant 0 : index
    %c0_13 = arith.constant 0 : index
    %15 = vector.load %arg6[%c0_12, %c0_13] : memref<2x64xf32, #tpu.memory_space<vmem>>, vector<2x64xf32>
    %cst_14 = arith.constant dense<0.000000e+00> : vector<2x4xf32>
    %16 = tpu.matmul %15, %14, %cst_14 {dimension_numbers = #tpu.dot_dimension_numbers<[1], [0], [0], [1], [0, 0, 1, 1], [], []>} : vector<2x64xf32>, vector<64x4xf32>, vector<2x4xf32> -> vector<2x4xf32>
    %c0_15 = arith.constant 0 : index
    %c0_16 = arith.constant 0 : index
    %17 = vector.load %arg7[%c0_15, %c0_16] : memref<2x1xf32, #tpu.memory_space<vmem>>, vector<2x1xf32>
    %18 = vector.broadcast %17 : vector<2x1xf32> to vector<2x4xf32>
    %19 = arith.addf %16, %18 : vector<2x4xf32>
    %cst_17 = arith.constant dense<0xFF800000> : vector<4xf32>
    %20 = vector.multi_reduction <maximumf>, %19, %cst_17 [0] : vector<2x4xf32> to vector<4xf32>
    %21 = vector.shape_cast %20 : vector<4xf32> to vector<1x4xf32>
    %22 = vector.broadcast %21 : vector<1x4xf32> to vector<2x4xf32>
    %23 = arith.subf %19, %22 : vector<2x4xf32>
    %24 = math.exp %23 : vector<2x4xf32>
    %cst_18 = arith.constant dense<0.000000e+00> : vector<4xf32>
    %25 = vector.multi_reduction <add>, %24, %cst_18 [0] : vector<2x4xf32> to vector<4xf32>
    %26 = vector.shape_cast %25 : vector<4xf32> to vector<1x4xf32>
    %27 = tpu.reciprocal %26 : vector<1x4xf32> -> vector<1x4xf32>
    %28 = vector.broadcast %27 : vector<1x4xf32> to vector<2x4xf32>
    %29 = arith.mulf %24, %28 : vector<2x4xf32>
    %c0_19 = arith.constant 0 : index
    %c0_20 = arith.constant 0 : index
    %30 = vector.load %arg8[%c0_19, %c0_20] : memref<2x4xf32, #tpu.memory_space<vmem>>, vector<2x4xf32>
    tpu.vector_store %arg8[%c0_19, %c0_20], %29 {strides = array<i32>} : memref<2x4xf32, #tpu.memory_space<vmem>>, vector<2x4xf32>,
    return
  }
  func.func @transform_0(%arg0: i32) -> (i32, i32) {
    %c0_i32 = arith.constant 0 : i32
    %c0_i32_0 = arith.constant 0 : i32
    return %c0_i32, %arg0 : i32, i32
  }
  func.func @transform_1(%arg0: i32) -> (i32, i32) {
    %c0_i32 = arith.constant 0 : i32
    %c0_i32_0 = arith.constant 0 : i32
    %c0_i32_1 = arith.constant 0 : i32
    return %c0_i32, %c0_i32_0 : i32, i32
  }
  func.func @transform_2(%arg0: i32) -> (i32, i32) {
    %c0_i32 = arith.constant 0 : i32
    %c0_i32_0 = arith.constant 0 : i32
    %c0_i32_1 = arith.constant 0 : i32
    return %c0_i32, %c0_i32_0 : i32, i32
  }
  func.func @transform_3(%arg0: i32) -> (i32, i32) {
    %c0_i32 = arith.constant 0 : i32
    %c0_i32_0 = arith.constant 0 : i32
    %c0_i32_1 = arith.constant 0 : i32
    return %c0_i32, %c0_i32_0 : i32, i32
  }
  func.func @transform_4(%arg0: i32) -> (i32, i32) {
    %c0_i32 = arith.constant 0 : i32
    %c0_i32_0 = arith.constant 0 : i32
    %c0_i32_1 = arith.constant 0 : i32
    return %c0_i32, %c0_i32_0 : i32, i32
  }
  func.func @transform_5(%arg0: i32) -> (i32, i32) {
    %c0_i32 = arith.constant 0 : i32
    %c0_i32_0 = arith.constant 0 : i32
    %c0_i32_1 = arith.constant 0 : i32
    return %c0_i32, %c0_i32_0 : i32, i32
  }
  func.func @transform_6(%arg0: i32) -> (i32, i32) {
    %c0_i32 = arith.constant 0 : i32
    %c0_i32_0 = arith.constant 0 : i32
    %c0_i32_1 = arith.constant 0 : i32
    return %c0_i32, %c0_i32_0 : i32, i32
  }
  func.func @transform_7(%arg0: i32) -> (i32, i32) {
    %c0_i32 = arith.constant 0 : i32
    %c0_i32_0 = arith.constant 0 : i32
    return %c0_i32, %arg0 : i32, i32
  }
}

</mosaic_0001>

<bundles_post_ra>
// kernel: policy_forward.1
= control target key start
LH: loop header
LB: loop body
LE: loop exit
PB: predicated region body
PF: predicated region fallthrough
CT: control target
= control target key end

     0   :  { %vm56_vm0 = vcmask 64512   ;;  %v365_v3 = vmov 0   ;;  %s506_s0 = inlined_call_operand.vmem [shape: f32[8,4], index: 0, kind: input, shape index: {}]   ;;  %s507_s1 = inlined_call_operand.vmem [shape: f32[32,8], index: 1, kind: input, shape index: {}]   ;;  %s508_s2 = inlined_call_operand.vmem [shape: f32[32,1], index: 2, kind: input, shape index: {}]   ;;  %s509_s3 = inlined_call_operand.vmem [shape: f32[64,32], index: 3, kind: input, shape index: {}]   ;;  %s510_s4 = inlined_call_operand.vmem [shape: f32[64,1], index: 4, kind: input, shape index: {}]   ;;  %s511_s5 = inlined_call_operand.vmem [shape: f32[2,64], index: 5, kind: input, shape index: {}]   ;;  %s512_s6 = inlined_call_operand.vmem [shape: f32[2,1], index: 6, kind: input, shape index: {}]   ;;  %s513_s7 = inlined_call_operand.hbm [shape: f32[2,4], index: 7, kind: output, shape index: {}]  }
   0x1   :  { %v27_v0 = vld [vmem:[%s506_s0] sm:$0xff]  ;;  %v35_v1 = vld [vmem:[%s508_s2 + $0x18] sm:$0xff]  ;;  %332 = vset.pattern.permute.xlu0 %v365_v3  ;;  %v33_v4 = vld [vmem:[%s508_s2 + $0x8] sm:$0xff]  ;;  %333 = vset.pattern.permute.xlu1 %v365_v3 }
   0x2   :  { %v28_v2 = vld [vmem:[%s507_s1] sm:$0xff]  ;;  %84 = vmatpush.msra.mxu0 %v27_v0  ;;  %53 = vperm.xlu0 %332, %v35_v1  }
   0x3   :  { %313 = vmatmul.msk.f32.vlgmr.msra.gmra.mxu0 %vm56_vm0, %v28_v2  ;;  %334 = vset.pattern.permute.xlu2 %v365_v3 }
   0x4   :  { %43 = vperm.xlu1 %333, %v33_v4  }
   0x5   :  { %12 = vsyncpa [#allocation3], 0  ;;  %v34_v5 = vld [vmem:[%s508_s2 + $0x10] sm:$0xff]  ;;  %v29_v6 = vld [vmem:[%s507_s1 + $0x8] sm:$0xff]  ;;  %vm158_vm1 = vcmask 261120   ;;  %vm239_vm2 = vcmask 523264  }
   0x6   :  { %v32_v7 = vld [vmem:[%s508_s2] sm:$0xff]  ;;  %v115_v8 = vld [vmem:[%s510_s4 + $0x28] sm:$0xff]  ;;  %v30_v9 = vld [vmem:[%s507_s1 + $0x10] sm:$0xff]  ;;  %vm263_vm3 = vcmask 25600  }
   0x7   :  { %v114_v10 = vld [vmem:[%s510_s4 + $0x20] sm:$0xff]  ;;  %v112_v11 = vld [vmem:[%s510_s4 + $0x10] sm:$0xff]  ;;  %v31_v12 = vld [vmem:[%s507_s1 + $0x18] sm:$0xff]  ;;  %s304_s1 = sshll.u32 %s513_s7, 4  ;;  %s305_s1 = int_to_ptr.hbm [resolvable:$true] %s304_s1 }
   0x8   :  { %v111_v13 = vld [vmem:[%s510_s4 + $0x8] sm:$0xff]  ;;  %v233_v14 = vld [vmem:[%s512_s6] sm:$0x3]  ;;  %v117_v27 = vld [vmem:[%s510_s4 + $0x38] sm:$0xff] }
   0x9   :  { %155 = vperm.xlu2 %334, %v117_v27   ;;  %v102_v32 = vld [vmem:[%s509_s3] sm:$0xff]  ;;  %v116_v34 = vld [vmem:[%s510_s4 + $0x30] sm:$0xff]  ;;  %v103_v35 = vld [vmem:[%s509_s3 + $0x8] sm:$0xff] }
   0xa   :  { %48 = vperm.xlu0 %332, %v34_v5   ;;  %v106_v33 = vld [vmem:[%s509_s3 + $0x20] sm:$0xff]  ;;  %v107_v36 = vld [vmem:[%s509_s3 + $0x28] sm:$0xff]  ;;  %v113_v37 = vld [vmem:[%s510_s4 + $0x18] sm:$0xff] }
   0xb   :  { %314 = vmatmul.msk.f32.gmra.mxu0 %vm56_vm0, %v29_v6  ;;  %v104_v38 = vld [vmem:[%s509_s3 + $0x10] sm:$0xff]  ;;  %v110_v40 = vld [vmem:[%s510_s4] sm:$0xff]  ;;  %v105_v41 = vld [vmem:[%s509_s3 + $0x18] sm:$0xff] }
   0xc   :  { %38 = vperm.xlu1 %333, %v32_v7   ;;  %v108_v39 = vld [vmem:[%s509_s3 + $0x30] sm:$0xff]  ;;  %v109_v42 = vld [vmem:[%s509_s3 + $0x38] sm:$0xff] }
  0x11   :  { %150 = vperm.xlu2 %334, %v116_v34  }
  0x12   :  { %145 = vperm.xlu0 %332, %v115_v8  }
  0x13   :  { %315 = vmatmul.msk.f32.gmra.mxu0 %vm56_vm0, %v30_v9 }
  0x14   :  { %140 = vperm.xlu1 %333, %v114_v10  }
  0x19   :  { %135 = vperm.xlu2 %334, %v113_v37  }
  0x1a   :  { %130 = vperm.xlu0 %332, %v112_v11   ;;  %v232_v11 = vld [vmem:[%s511_s5] sm:$0x3]  ;;  %s366_s5 = smov [#allocation2]  }
  0x1b   :  { %316 = vmatmul.msk.f32.gmra.mxu0 %vm56_vm0, %v31_v12  ;;  %s302_s24 = sshll.u32 %s366_s5, 4  ;;  %s303_s24 = int_to_ptr.vmem [resolvable:$true] %s302_s24 }
  0x1c   :  { %125 = vperm.xlu1 %333, %v111_v13  }
  0x21   :  { %120 = vperm.xlu2 %334, %v110_v40  }
  0x22   :  { %236 = vperm.xlu0 %332, %v233_v14  }
  0x63   :  { %v156_v45 = vpop.permute.xlu2 %155 }
  0x6b   :  { %v151_v48 = vpop.permute.xlu2 %150 }
  0x73   :  { %v136_v53 = vpop.permute.xlu2 %135 }
  0x74   :  { %v54_v17 = vpop.permute.xlu0 %53 }
  0x76   :  { %v44_v18 = vpop.permute.xlu1 %43 }
  0x7b   :  { %v121_v4 = vpop.permute.xlu2 %120 }
  0x7c   :  { %v49_v20 = vpop.permute.xlu0 %48 }
  0x7e   :  { %v39_v24 = vpop.permute.xlu1 %38 }
  0x80   :  { %v86_v15 = vpop.f32.mrf.mxu0 }
  0x81   :  { %v87_v28 = vadd.f32 %v86_v15, %v39_v24 }
  0x83   :  { %v98_v31 = vmax.f32 %v87_v28, 0.0 }
  0x84   :  { %v146_v51 = vpop.permute.xlu0 %145 }
  0x86   :  { %v141_v52 = vpop.permute.xlu1 %140 }
  0x88   :  { %v89_v16 = vpop.f32.mrf.mxu0 }
  0x89   :  { %v90_v25 = vadd.f32 %v89_v16, %v44_v18 }
  0x8b   :  { %v99_v30 = vmax.f32 %v90_v25, 0.0 }
  0x8c   :  { %v131_v0 = vpop.permute.xlu0 %130 }
  0x8e   :  { %v126_v3 = vpop.permute.xlu1 %125 }
  0x90   :  { %v92_v19 = vpop.f32.mrf.mxu0 }
  0x91   :  { %v93_v22 = vadd.f32 %v92_v19, %v49_v20 }
  0x93   :  { %v100_v29 = vmax.f32 %v93_v22, 0.0 }
  0x94   :  { %v237_v12 = vpop.permute.xlu0 %236 }
  0x98   :  { %v95_v21 = vpop.f32.mrf.mxu0 }
  0x99   :  { %v96_v23 = vadd.f32 %v95_v21, %v54_v17 }
  0x9b   :  { %v101_v26 = vmax.f32 %v96_v23, 0.0 }
  0x9d   :  { %195 = vmatpush.msra.mxu1 %v101_v26  ;;  %326 = vmatpush.msra.mxu3 %v101_v26 }
  0x9f   :  { %196 = vmatpush.msra.mxu1 %v100_v29  ;;  %327 = vmatpush.msra.mxu3 %v100_v29 }
  0xa1   :  { %197 = vmatpush.msra.mxu1 %v99_v30  ;;  %328 = vmatpush.msra.mxu3 %v99_v30 }
  0xa3   :  { %198 = vmatpush.msra.mxu1 %v98_v31  ;;  %329 = vmatpush.msra.mxu3 %v98_v31 }
  0xa4   :  { %317 = vmatmul.msk.f32.vlgmr.msra.gmra.mxu1 %vm158_vm1, %v102_v32  ;;  %321 = vmatmul.msk.f32.vlgmr.msra.gmra.mxu3 %vm158_vm1, %v106_v33 }
  0xac   :  { %318 = vmatmul.msk.f32.gmra.mxu1 %vm158_vm1, %v103_v35  ;;  %322 = vmatmul.msk.f32.gmra.mxu3 %vm158_vm1, %v107_v36 }
  0xb4   :  { %319 = vmatmul.msk.f32.gmra.mxu1 %vm158_vm1, %v104_v38  ;;  %323 = vmatmul.msk.f32.gmra.mxu3 %vm158_vm1, %v108_v39 }
  0xbc   :  { %320 = vmatmul.msk.f32.gmra.mxu1 %vm158_vm1, %v105_v41  ;;  %324 = vmatmul.msk.f32.gmra.mxu3 %vm158_vm1, %v109_v42 }
 0x121   :  { %v200_v43 = vpop.f32.mrf.mxu1 }
 0x122   :  { %v201_v7 = vadd.f32 %v200_v43, %v121_v4 }
 0x124   :  { %v224_v10 = vmax.f32 %v201_v7, 0.0 }
 0x127   :  { %v212_v44 = vpop.f32.mrf.mxu3 }
 0x128   :  { %v213_v60 = vadd.f32 %v212_v44, %v141_v52 }
 0x129   :  { %v203_v46 = vpop.f32.mrf.mxu1 }
 0x12a   :  { %v228_v1 = vmax.f32 %v213_v60, 0.0  ;;  %v204_v5 = vadd.f32 %v203_v46, %v126_v3 }
 0x12c   :  { %v225_v9 = vmax.f32 %v204_v5, 0.0 }
 0x12f   :  { %v215_v47 = vpop.f32.mrf.mxu3 }
 0x130   :  { %v216_v57 = vadd.f32 %v215_v47, %v146_v51 }
 0x131   :  { %v206_v50 = vpop.f32.mrf.mxu1 }
 0x132   :  { %v229_v62 = vmax.f32 %v216_v57, 0.0  ;;  %v207_v2 = vadd.f32 %v206_v50, %v131_v0 }
 0x134   :  { %v226_v8 = vmax.f32 %v207_v2, 0.0 }
 0x137   :  { %v218_v49 = vpop.f32.mrf.mxu3 }
 0x138   :  { %v219_v55 = vadd.f32 %v218_v49, %v151_v48 }
 0x139   :  { %v209_v59 = vpop.f32.mrf.mxu1 }
 0x13a   :  { %v230_v61 = vmax.f32 %v219_v55, 0.0  ;;  %v210_v63 = vadd.f32 %v209_v59, %v136_v53 }
 0x13c   :  { %v227_v6 = vmax.f32 %v210_v63, 0.0 }
 0x13f   :  { %v221_v54 = vpop.f32.mrf.mxu3 }
 0x140   :  { %v222_v56 = vadd.f32 %v221_v54, %v156_v45 }
 0x142   :  { %v231_v58 = vmax.f32 %v222_v56, 0.0 }
 0x144   :  { %251 = vmatpush.msra.mxu2 %v231_v58 }
 0x146   :  { %252 = vmatpush.msra.mxu2 %v230_v61 }
 0x148   :  { %253 = vmatpush.msra.mxu2 %v229_v62 }
 0x14a   :  { %254 = vmatpush.msra.mxu2 %v228_v1 }
 0x14c   :  { %255 = vmatpush.msra.mxu2 %v227_v6 }
 0x14e   :  { %256 = vmatpush.msra.mxu2 %v226_v8 }
 0x150   :  { %257 = vmatpush.msra.mxu2 %v225_v9 }
 0x152   :  { %258 = vmatpush.msra.mxu2 %v224_v10 }
 0x153   :  { %325 = vmatmul.msk.f32.vlgmr.msra.gmra.mxu2 %vm239_vm2, %v232_v11 }
 0x1d6   :  { %v260_v13 = vpop.f32.mrf.mxu2 }
 0x1d7   :  { %v261_v14 = vadd.f32 %v260_v13, %v237_v12 }
 0x1d9   :  { %v264_v15 = vsel %vm263_vm3, %v261_v14, -inf }
 0x1da   :  { %v265_v16 = vrot.slane %v264_v15, 4 }
 0x1dc   :  { %v266_v17 = vmax.f32 %v264_v15, %v265_v16 }
 0x1de   :  { %v267_v18 = vrot.slane %v266_v17, 2 }
 0x1e0   :  { %v268_v19 = vmax.f32 %v266_v17, %v267_v18 }
 0x1e2   :  { %v269_v20 = vrot.slane %v268_v19, 1 }
 0x1e4   :  { %v270_v21 = vmax.f32 %v268_v19, %v269_v20 }
 0x1e6   :  { %v271_v22 = vsub.f32 %v261_v14, %v270_v21 }
 0x1e8   :  { %v272_v23 = vmul.f32 1.442695, %v271_v22 }
 0x1ea   :  { %335 = vpow2.f32 %v272_v23 }
 0x1f0   :  { %v336_v24 = vpop.eup %335 }
 0x1f1   :  { %v274_v25 = vsel %vm263_vm3, %v336_v24, 0.0 }
 0x1f2   :  { %v275_v26 = vrot.slane %v274_v25, 4 }
 0x1f4   :  { %v276_v27 = vadd.f32 %v275_v26, %v274_v25 }
 0x1f6   :  { %v277_v28 = vrot.slane %v276_v27, 2 }
 0x1f8   :  { %v278_v29 = vadd.f32 %v277_v28, %v276_v27 }
 0x1fa   :  { %v279_v30 = vrot.slane %v278_v29, 1 }
 0x1fc   :  { %v280_v31 = vadd.f32 %v279_v30, %v278_v29 }
 0x1fe   :  { %337 = vrcp.f32 %v280_v31  ;;  %v292_v35 = vand.u32 2147483648, %v280_v31  ;;  %v290_v37 = vand.u32 2147483647, %v280_v31  ;;  %vm286_vm5 = vweird.f32 %v280_v31 }
 0x200   :  { %v293_v39 = vor.u32 1.1754944e-38, %v292_v35  ;;  %vm291_vm7 = vcmp.eq.f32.partialorder %v290_v37, 8.507059e+37 }
 0x204   :  { %v338_v32 = vpop.eup %337 }
 0x205   :  { %v282_v33 = vmul.f32 %v338_v32, %v280_v31  ;;  %vm287_vm4 = vweird.f32 %v338_v32 }
 0x206   :  { %vm288_vm6 = vmor %vm286_vm5, %vm287_vm4 }
 0x207   :  { %v283_v34 = vsub.f32 1.0, %v282_v33 }
 0x209   :  { %v284_v36 = vmul.f32 %v338_v32, %v283_v34 }
 0x20b   :  { %v285_v38 = vadd.f32 %v338_v32, %v284_v36 }
 0x20d   :  { %v289_v40 = vsel %vm288_vm6, %v338_v32, %v285_v38 }
 0x20e   :  { %v294_v41 = vsel %vm291_vm7, %v293_v39, %v289_v40 }
 0x20f   :  { %v295_v42 = vmul.f32 %v336_v24, %v294_v41 }
 0x211   :  { %296 = vst.msk [vmem:[#allocation2] sm:$0x3] %vm263_vm3, %v295_v42 }
 0x212   :  { %307 = dma.vmem_to_hbm [thread:$0]  %s303_s24, 32, %s305_s1, [#allocation3]  }
 0x213   :  { %363 = dma.done.wait [#allocation3], 32  }
 0x214   :  { %364 = vsyncadd [#allocation3], 4294967264 }
 0x215   :  { %312 = vsyncpa [#allocation3], 1 }

</bundles_post_ra>
